<compile_context>
chip_gen: v6e
topology: v6e:2x2x1
jax: 0.10.0
libtpu: 0.0.40
codegen_flags: <defaults>
</compile_context>

<pallas_src>
import functools

import jax
import jax.numpy as jnp
from jax.experimental import pallas as pl
from jax.experimental.pallas import tpu as pltpu

LEAKY_SLOPE = 0.01   # PyTorch nn.LeakyReLU default negative_slope
LANE = 128           # lane width for the lane-dense partial-sum slab


def _leaky_relu(x):
    return jnp.where(x > 0, x, LEAKY_SLOPE * x)


def _round_up(x, m):
    return -(-x // m) * m


@functools.lru_cache(maxsize=None)
def _vmem_limit_bytes():
    """Generation-aware scoped-VMEM limit with ~25% headroom."""
    cap = None
    try:
        cap = getattr(pltpu.get_tpu_info(), "vmem_capacity_bytes", None)
    except Exception:  # hardware query unavailable -> conservative default
        cap = None
    if not cap:
        cap = 64 * 1024 * 1024  # v7x-safe default
    # 128 MiB (v5e/v6e) -> 96 MiB limit; 64 MiB (v7x) -> 48 MiB limit.
    return int(min(cap * 3 // 4, 100 * 1024 * 1024))


def expr_decoder_kernel(x_ref, w1_ref, b1_ref, w2_ref, b2_ref, w3_ref, o_ref):
    # Layers 1 & 2: bf16 MXU matmuls with f32 accumulation; bias + LeakyReLU
    # in f32 on the VPU (v5e-safe: no bf16 VPU/EUP math required).
    x = x_ref[...].astype(w1_ref.dtype)                 # in-kernel cast, no extra HBM pass
    h = jnp.dot(x, w1_ref[...], preferred_element_type=jnp.float32)
    h = _leaky_relu(h + b1_ref[...])
    h = jnp.dot(h.astype(w2_ref.dtype), w2_ref[...],
                preferred_element_type=jnp.float32)
    h = _leaky_relu(h + b2_ref[...])

    # Layer 3 (d_model -> 1) as a VPU epilogue instead of a 127/128-wasted MXU
    # matmul: elementwise h * w3, then accumulate lane-aligned 128-wide chunks
    # into a lane-dense partial-sum slab.  The wrapper finishes sum(-1) + b3.
    t = h * w3_ref[...]                                  # (tm, d) f32
    d = t.shape[-1]
    ow = o_ref.shape[-1]
    slab = t[:, :ow]
    for j in range(1, d // ow):                          # static, lane-aligned slices
        slab = slab + t[:, j * ow:(j + 1) * ow]
    o_ref[...] = slab.astype(o_ref.dtype)                # lane-dense (tm, ow) store


def _build_call(n, d_model, tm, ow, out_dtype):
    const = lambda i: (0, 0)   # weights/biases: single resident block
    return pl.pallas_call(
        expr_decoder_kernel,
        out_shape=jax.ShapeDtypeStruct((n, ow), out_dtype),
        grid_spec=pltpu.PrefetchScalarGridSpec(
            num_scalar_prefetch=0,
            grid=(pl.cdiv(n, tm),),
            in_specs=[
                pl.BlockSpec((tm, d_model), lambda i: (i, 0)),   # x row tile (native dtype)
                pl.BlockSpec((d_model, d_model), const),         # W1^T (bf16)
                pl.BlockSpec((1, d_model), const),               # b1   (f32)
                pl.BlockSpec((d_model, d_model), const),         # W2^T (bf16)
                pl.BlockSpec((1, d_model), const),               # b2   (f32)
                pl.BlockSpec((1, d_model), const),               # w3 row (f32)
            ],
            out_specs=pl.BlockSpec((tm, ow), lambda i: (i, 0)),
        ),
        compiler_params=pltpu.CompilerParams(
            dimension_semantics=("parallel",),   # shard row grid across v7x TCs
            vmem_limit_bytes=_vmem_limit_bytes(),
        ),
    )


def expr_decoder_forward(x, params, tm=1024, compute_dtype=jnp.bfloat16):
    """x: (batch, seq_len, d_model) -> (batch, seq_len, 1)."""
    w1, b1, w2, b2, w3, b3 = params
    batch, seq_len, d_model = x.shape
    n = batch * seq_len
    x2 = x.reshape(n, d_model)            # no dtype cast, no padding pass

    # Row tile: multiple of 16 (bf16 sublane packing).  Small inputs: one
    # full-height step.  Large inputs: an even number of >= 2 grid steps so
    # both v7x TensorCores get balanced work; per-step overhead stays <~10%.
    tm_req = max(16, _round_up(int(tm), 16))
    if n <= tm_req:
        tm_eff = _round_up(n, 16)
    else:
        steps = pl.cdiv(n, tm_req)
        if steps % 2:
            steps += 1
        tm_eff = _round_up(pl.cdiv(n, steps), 16)

    # Small one-off weight casts (O(d^2), negligible vs. activations).
    w1c = w1.astype(compute_dtype)
    w2c = w2.astype(compute_dtype)
    b1c = b1.reshape(1, d_model).astype(jnp.float32)
    b2c = b2.reshape(1, d_model).astype(jnp.float32)
    w3row = w3.reshape(1, d_model).astype(jnp.float32)

    # Lane-dense slab width: 128 when d_model is a lane multiple, else d_model
    # (== full array dim, still a legal block).
    ow = LANE if d_model % LANE == 0 else d_model

    slab = _build_call(n, d_model, tm_eff, ow, jnp.bfloat16)(
        x2, w1c, b1c, w2c, b2c, w3row)                        # (n, ow) bf16

    pred = jnp.sum(slab, axis=-1, keepdims=True, dtype=jnp.float32)
    pred = pred + b3.reshape(1, 1).astype(jnp.float32)
    return pred.reshape(batch, seq_len, 1).astype(x.dtype)


def init_expr_decoder_params(key, d_model, dtype=jnp.float32):
    """Deterministic synthetic init (PyTorch-Linear-style uniform bound).

    Weights stored pre-transposed (in_features, out_features) so the kernel
    computes x @ W + b, matching PyTorch's x @ W.T + b.
    """
    ks = jax.random.split(key, 6)
    bound = 1.0 / jnp.sqrt(d_model)
    w1 = jax.random.uniform(ks[0], (d_model, d_model), dtype, -bound, bound)
    b1 = jax.random.uniform(ks[1], (1, d_model), dtype, -bound, bound)
    w2 = jax.random.uniform(ks[2], (d_model, d_model), dtype, -bound, bound)
    b2 = jax.random.uniform(ks[3], (1, d_model), dtype, -bound, bound)
    w3 = jax.random.uniform(ks[4], (d_model, 1), dtype, -bound, bound)
    b3 = jax.random.uniform(ks[5], (1, 1), dtype, -bound, bound)
    return (w1, b1, w2, b2, w3, b3)


def expr_decoder_reference(x, params):
    """Pure-JAX f32 reference for correctness check."""
    w1, b1, w2, b2, w3, b3 = params
    h = _leaky_relu(x @ w1 + b1)
    h = _leaky_relu(h @ w2 + b2)
    return h @ w3 + b3


if __name__ == "__main__":
    key = jax.random.PRNGKey(0)

    # --- Test 1: toy shape (d_model < 128, single grid step) -----------------
    batch, seq_len, d_model = 2, 8, 32
    k_x, k_p, k_x2, k_p2 = jax.random.split(key, 4)

    x = jax.random.normal(k_x, (batch, seq_len, d_model), dtype=jnp.float32)
    params = init_expr_decoder_params(k_p, d_model)

    out = jax.block_until_ready(expr_decoder_forward(x, params))
    ref = expr_decoder_reference(x, params)
    assert out.shape == (batch, seq_len, 1), out.shape
    # bf16 MXU operands / bf16 slab with f32 accumulation: bf16-level tolerance.
    assert jnp.allclose(out, ref, atol=2e-2, rtol=2e-2), "mismatch vs reference (d=32)"

    # --- Test 2: lane-multiple d_model, multi-step grid with a ragged edge ---
    batch2, seq_len2, d_model2 = 2, 40, 256     # n = 80 rows, forced tm=48 -> grid of 2
    x2 = jax.random.normal(k_x2, (batch2, seq_len2, d_model2), dtype=jnp.float32)
    params2 = init_expr_decoder_params(k_p2, d_model2)

    out2 = jax.block_until_ready(expr_decoder_forward(x2, params2, tm=48))
    ref2 = expr_decoder_reference(x2, params2)
    assert out2.shape == (batch2, seq_len2, 1), out2.shape
    assert jnp.allclose(out2, ref2, atol=2e-2, rtol=2e-2), "mismatch vs reference (d=256)"

    print("KERNEL_OK")
</pallas_src>

<mosaic_0001>
module attributes {stable_mosaic.version = 11 : i64} {
  func.func @expr_decoder_kernel(%arg0: i32, %arg1: memref<16x32xf32, #tpu.memory_space<vmem>>, %arg2: memref<32x32xbf16, #tpu.memory_space<vmem>>, %arg3: memref<1x32xf32, #tpu.memory_space<vmem>>, %arg4: memref<32x32xbf16, #tpu.memory_space<vmem>>, %arg5: memref<1x32xf32, #tpu.memory_space<vmem>>, %arg6: memref<1x32xf32, #tpu.memory_space<vmem>>, %arg7: memref<16x32xbf16, #tpu.memory_space<vmem>>) attributes {dimension_semantics = [#tpu.dimension_semantics<parallel>], iteration_bounds = array<i64: 1>, scalar_prefetch = 0 : i64, scratch_operands = 0 : i64, tpu.core_type = #tpu.core_type<tc>, window_params = [{transform_indices = @transform_0, window_bounds = array<i64: 16, 32>}, {pipeline_mode = #tpu.pipeline_mode<synchronous>, transform_indices = @transform_1, window_bounds = array<i64: 32, 32>}, {pipeline_mode = #tpu.pipeline_mode<synchronous>, transform_indices = @transform_2, window_bounds = array<i64: 1, 32>}, {pipeline_mode = #tpu.pipeline_mode<synchronous>, transform_indices = @transform_3, window_bounds = array<i64: 32, 32>}, {pipeline_mode = #tpu.pipeline_mode<synchronous>, transform_indices = @transform_4, window_bounds = array<i64: 1, 32>}, {pipeline_mode = #tpu.pipeline_mode<synchronous>, transform_indices = @transform_5, window_bounds = array<i64: 1, 32>}, {transform_indices = @transform_6, window_bounds = array<i64: 16, 32>}]} {
    %c0 = arith.constant 0 : index
    %c0_0 = arith.constant 0 : index
    %0 = vector.load %arg1[%c0, %c0_0] : memref<16x32xf32, #tpu.memory_space<vmem>>, vector<16x32xf32>
    %1 = arith.truncf %0 : vector<16x32xf32> to vector<16x32xbf16>
    %c0_1 = arith.constant 0 : index
    %c0_2 = arith.constant 0 : index
    %2 = vector.load %arg2[%c0_1, %c0_2] : memref<32x32xbf16, #tpu.memory_space<vmem>>, vector<32x32xbf16>
    %cst = arith.constant dense<0.000000e+00> : vector<16x32xf32>
    %3 = tpu.matmul %1, %2, %cst {dimension_numbers = #tpu.dot_dimension_numbers<[1], [0], [0], [1], [0, 0, 1, 1], [], []>} : vector<16x32xbf16>, vector<32x32xbf16>, vector<16x32xf32> -> vector<16x32xf32>
    %c0_3 = arith.constant 0 : index
    %c0_4 = arith.constant 0 : index
    %4 = vector.load %arg3[%c0_3, %c0_4] : memref<1x32xf32, #tpu.memory_space<vmem>>, vector<1x32xf32>
    %5 = vector.broadcast %4 : vector<1x32xf32> to vector<16x32xf32>
    %6 = arith.addf %3, %5 : vector<16x32xf32>
    %cst_5 = arith.constant 0.000000e+00 : f32
    %7 = vector.broadcast %cst_5 : f32 to vector<16x32xf32>
    %8 = arith.cmpf ogt, %6, %7 : vector<16x32xf32>
    %cst_6 = arith.constant 0.00999999977 : f32
    %9 = vector.broadcast %cst_6 : f32 to vector<16x32xf32>
    %10 = arith.mulf %9, %6 : vector<16x32xf32>
    %11 = arith.select %8, %6, %10 : vector<16x32xi1>, vector<16x32xf32>
    %12 = arith.truncf %11 : vector<16x32xf32> to vector<16x32xbf16>
    %c0_7 = arith.constant 0 : index
    %c0_8 = arith.constant 0 : index
    %13 = vector.load %arg4[%c0_7, %c0_8] : memref<32x32xbf16, #tpu.memory_space<vmem>>, vector<32x32xbf16>
    %cst_9 = arith.constant dense<0.000000e+00> : vector<16x32xf32>
    %14 = tpu.matmul %12, %13, %cst_9 {dimension_numbers = #tpu.dot_dimension_numbers<[1], [0], [0], [1], [0, 0, 1, 1], [], []>} : vector<16x32xbf16>, vector<32x32xbf16>, vector<16x32xf32> -> vector<16x32xf32>
    %c0_10 = arith.constant 0 : index
    %c0_11 = arith.constant 0 : index
    %15 = vector.load %arg5[%c0_10, %c0_11] : memref<1x32xf32, #tpu.memory_space<vmem>>, vector<1x32xf32>
    %16 = vector.broadcast %15 : vector<1x32xf32> to vector<16x32xf32>
    %17 = arith.addf %14, %16 : vector<16x32xf32>
    %cst_12 = arith.constant 0.000000e+00 : f32
    %18 = vector.broadcast %cst_12 : f32 to vector<16x32xf32>
    %19 = arith.cmpf ogt, %17, %18 : vector<16x32xf32>
    %cst_13 = arith.constant 0.00999999977 : f32
    %20 = vector.broadcast %cst_13 : f32 to vector<16x32xf32>
    %21 = arith.mulf %20, %17 : vector<16x32xf32>
    %22 = arith.select %19, %17, %21 : vector<16x32xi1>, vector<16x32xf32>
    %c0_14 = arith.constant 0 : index
    %c0_15 = arith.constant 0 : index
    %23 = vector.load %arg6[%c0_14, %c0_15] : memref<1x32xf32, #tpu.memory_space<vmem>>, vector<1x32xf32>
    %24 = vector.broadcast %23 : vector<1x32xf32> to vector<16x32xf32>
    %25 = arith.mulf %22, %24 : vector<16x32xf32>
    %26 = arith.truncf %25 : vector<16x32xf32> to vector<16x32xbf16>
    %c0_16 = arith.constant 0 : index
    %c0_17 = arith.constant 0 : index
    %27 = vector.load %arg7[%c0_16, %c0_17] : memref<16x32xbf16, #tpu.memory_space<vmem>>, vector<16x32xbf16>
    tpu.vector_store %arg7[%c0_16, %c0_17], %26 {strides = array<i32>} : memref<16x32xbf16, #tpu.memory_space<vmem>>, vector<16x32xbf16>,
    return
  }
  func.func @transform_0(%arg0: i32) -> (i32, i32) {
    %c0_i32 = arith.constant 0 : i32
    %c0_i32_0 = arith.constant 0 : i32
    return %arg0, %c0_i32 : i32, i32
  }
  func.func @transform_1(%arg0: i32) -> (i32, i32) {
    %c0_i32 = arith.constant 0 : i32
    %c0_i32_0 = arith.constant 0 : i32
    %c0_i32_1 = arith.constant 0 : i32
    return %c0_i32, %c0_i32_0 : i32, i32
  }
  func.func @transform_2(%arg0: i32) -> (i32, i32) {
    %c0_i32 = arith.constant 0 : i32
    %c0_i32_0 = arith.constant 0 : i32
    %c0_i32_1 = arith.constant 0 : i32
    return %c0_i32, %c0_i32_0 : i32, i32
  }
  func.func @transform_3(%arg0: i32) -> (i32, i32) {
    %c0_i32 = arith.constant 0 : i32
    %c0_i32_0 = arith.constant 0 : i32
    %c0_i32_1 = arith.constant 0 : i32
    return %c0_i32, %c0_i32_0 : i32, i32
  }
  func.func @transform_4(%arg0: i32) -> (i32, i32) {
    %c0_i32 = arith.constant 0 : i32
    %c0_i32_0 = arith.constant 0 : i32
    %c0_i32_1 = arith.constant 0 : i32
    return %c0_i32, %c0_i32_0 : i32, i32
  }
  func.func @transform_5(%arg0: i32) -> (i32, i32) {
    %c0_i32 = arith.constant 0 : i32
    %c0_i32_0 = arith.constant 0 : i32
    %c0_i32_1 = arith.constant 0 : i32
    return %c0_i32, %c0_i32_0 : i32, i32
  }
  func.func @transform_6(%arg0: i32) -> (i32, i32) {
    %c0_i32 = arith.constant 0 : i32
    %c0_i32_0 = arith.constant 0 : i32
    return %arg0, %c0_i32 : i32, i32
  }
}

</mosaic_0001>

<bundles_post_ra>
// kernel: tpu_custom_call.1
= control target key start
LH: loop header
LB: loop body
LE: loop exit
PB: predicated region body
PF: predicated region fallthrough
CT: control target
= control target key end

     0   :  { %11 = vsyncpa [#allocation3], 0  ;;  %s467_s0 = inlined_call_operand.hbm [shape: f32[16,32], index: 0, kind: input, shape index: {}]   ;;  %s468_s1 = inlined_call_operand.hbm [shape: bf16[32,32], index: 1, kind: input, shape index: {}]   ;;  %s469_s2 = inlined_call_operand.vmem [shape: f32[1,32], index: 2, kind: input, shape index: {}]   ;;  %s470_s3 = inlined_call_operand.hbm [shape: bf16[32,32], index: 3, kind: input, shape index: {}]   ;;  %s471_s4 = inlined_call_operand.vmem [shape: f32[1,32], index: 4, kind: input, shape index: {}]   ;;  %s472_s5 = inlined_call_operand.vmem [shape: f32[1,32], index: 5, kind: input, shape index: {}]   ;;  %s473_s6 = inlined_call_operand.hbm [shape: bf16[16,32], index: 6, kind: output, shape index: {}]  }
   0x1   :  { %12 = vsyncpa [#allocation6], 0 }
   0x2   :  { %13 = vsyncpa [#allocation4], 0  ;;  %s390_s21 = smov [#allocation5]  }
   0x3   :  { %s31_s22 = sshll.u32 %s390_s21, 4  ;;  %s32_s22 = int_to_ptr.vmem [resolvable:$true] %s31_s22 }
   0x4   :  { %s312_s23 = scalar_lea.vmem %s32_s22, 256  ;;  %p317_p1 = scmp.lt.s32.totalorder %s32_s22, %s32_s22 }
   0x5   :  { %p313_p0 = scmp.ne.s32.totalorder %s32_s22, %s312_s23  ;;  %p318_p2 = scmp.lt.s32.totalorder %s312_s23, %s312_s23 }
   0x7   :  { %p319_p3 = por %p318_p2, %p317_p1 }
   0x9   :  { %p320_p4 = pnand %p319_p3, %p313_p0 }
   0xb   :  { %323 = shalt.err (!%p320_p4)
}
   0xc   :  { %s391_s24 = smov 64   ;;  %s392_s25 = smov 4  }
   0xd   :  { %37 = dma.hbm_to_vmem [thread:$0]  %s468_s1, 256, %s32_s22, [#allocation6], %s391_s24, %s391_s24, %s392_s25  }
   0xe   :  { %s393_s28 = smov [#allocation2]  }
   0xf   :  { %s19_s29 = sshll.u32 %s393_s28, 4  ;;  %s20_s29 = int_to_ptr.vmem [resolvable:$true] %s19_s29 }
  0x10   :  { %s332_s30 = scalar_lea.vmem %s20_s29, 256  ;;  %p337_p6 = scmp.lt.s32.totalorder %s20_s29, %s20_s29 }
  0x11   :  { %p333_p5 = scmp.ne.s32.totalorder %s20_s29, %s332_s30  ;;  %p338_p7 = scmp.lt.s32.totalorder %s332_s30, %s332_s30 }
  0x13   :  { %p339_p8 = por %p338_p7, %p337_p6 }
  0x15   :  { %p340_p9 = pnand %p339_p8, %p333_p5 }
  0x17   :  { %343 = shalt.err (!%p340_p9)
}
  0x18   :  { %s394_s7 = smov 128   ;;  %s395_s8 = smov 8  }
  0x19   :  { %25 = dma.hbm_to_vmem [thread:$0]  %s467_s0, 256, %s20_s29, [#allocation3], %s394_s7, %s394_s7, %s395_s8  }
  0x1a   :  { %s396_s11 = smov [#allocation7]  }
  0x1b   :  { %s45_s12 = sshll.u32 %s396_s11, 4  ;;  %s46_s12 = int_to_ptr.vmem [resolvable:$true] %s45_s12 }
  0x1c   :  { %s352_s1 = scalar_lea.vmem %s46_s12, 256  ;;  %p357_p11 = scmp.lt.s32.totalorder %s46_s12, %s46_s12 }
  0x1d   :  { %p353_p10 = scmp.ne.s32.totalorder %s46_s12, %s352_s1  ;;  %p358_p12 = scmp.lt.s32.totalorder %s352_s1, %s352_s1 }
  0x1f   :  { %p359_p13 = por %p358_p12, %p357_p11 }
  0x21   :  { %p360_p0 = pnand %p359_p13, %p353_p10 }
  0x23   :  { %363 = shalt.err (!%p360_p0)
}
  0x24   :  { %51 = dma.hbm_to_vmem [thread:$0]  %s470_s3, 256, %s46_s12, [#allocation6], %s391_s24, %s391_s24, %s392_s25  }
  0x25   :  { %384 = dma.done.wait [#allocation3], 256  }
  0x26   :  { %385 = vsyncadd [#allocation3], 4294967040 }
  0x27   :  { %386 = dma.done.wait [#allocation6], 512  }
  0x28   :  { %387 = vsyncadd [#allocation6], 4294966784  ;;  %v397_v0 = vmov 0.0   ;;  %vm398_vm0 = vmmov 0   ;;  %v300_v1 = vld [vmem:[#allocation5 + $0x8] sm:$0xff]   ;;  %v301_v2 = vld [vmem:[#allocation5] sm:$0xff]  }
  0x29   :  { %274 = vmatprep.subr.bf16.mxu0 %v397_v0  ;;  %278 = vmatprep.mubr.msk.bf16.mxu0 %vm398_vm0, %v397_v0  ;;  %v66_v3 = vld [vmem:[#allocation2] sm:$0xff]  ;;  %v67_v4 = vld [vmem:[#allocation2 + $0x8] sm:$0xff]  ;;  %vm92_vm1 = vcmask 261120   ;;  %vm234_vm6 = vcmask 257024  }
  0x2a   :  { %282 = vmatprep.subr.bf16.mxu1 %v397_v0  ;;  %286 = vmatprep.mubr.msk.bf16.mxu1 %vm398_vm0, %v397_v0  ;;  %v68_v5 = vpack.c.bf16 %v67_v4, %v66_v3  ;;  %v302_v6 = vld [vmem:[#allocation7 + $0x8] sm:$0xff]   ;;  %v303_v7 = vld [vmem:[#allocation7] sm:$0xff]  }
  0x2b   :  { %275 = vmatpush3.bf16.msra.mxu0 %v300_v1  ;;  %283 = vmatpush3.bf16.msra.mxu1 %v302_v6  ;;  %v255_v8 = vld [vmem:[%s469_s2] ss:$0 sm:$0xff] }
  0x2c   :  { %276 = vmatprep.subr.bf16.mxu0 %v397_v0  ;;  %284 = vmatprep.subr.bf16.mxu1 %v397_v0  ;;  %v259_v20 = vld [vmem:[%s471_s4] ss:$0 sm:$0xff]  ;;  %s399_s4 = smov [#allocation8]  }
  0x2d   :  { %v263_v25 = vld [vmem:[%s472_s5] ss:$0 sm:$0xff]  ;;  %s242_s18 = sshll.u32 %s399_s4, 4  ;;  %s243_s18 = int_to_ptr.vmem [resolvable:$true] %s242_s18 }
  0x2e   :  { %s364_s19 = scalar_lea.vmem %s243_s18, 128  ;;  %p369_p2 = scmp.lt.s32.totalorder %s243_s18, %s243_s18 }
  0x2f   :  { %277 = vmatpush3.bf16.msra.mxu0 %v301_v2  ;;  %285 = vmatpush3.bf16.msra.mxu1 %v303_v7  ;;  %p365_p1 = scmp.ne.s32.totalorder %s243_s18, %s364_s19  ;;  %p370_p3 = scmp.lt.s32.totalorder %s364_s19, %s364_s19 }
  0x31   :  { %p371_p4 = por %p370_p3, %p369_p2 }
  0x32   :  { %279 = vmatmul.mubr.msk.bf16.vlgmr.msra.gmra.mxu0 %vm92_vm1, %v68_v5 }
  0x33   :  { %p372_p5 = pnand %p371_p4, %p365_p1 }
  0xf2   :  { %v130_v9 = vpop.f32.mrf.mxu0 }
  0xf3   :  { %v131_v10 = vadd.f32 %v255_v8, %v130_v9 }
  0xf4   :  { %v280_v11 = vpop.f32.mrf.mxu0 }
  0xf5   :  { %v139_v13 = vmul.f32 0.01, %v131_v10  ;;  %vm137_vm2 = vcmp.gt.f32.partialorder %v131_v10, 0.0 }
  0xf6   :  { %v133_v12 = vpop.f32.mrf.mxu0 }
  0xf7   :  { %v134_v14 = vadd.f32 %v255_v8, %v133_v12  ;;  %v141_v17 = vsel %vm137_vm2, %v131_v10, %v139_v13 }
  0xf8   :  { %v281_v15 = vpop.f32.mrf.mxu0 }
  0xf9   :  { %vm138_vm3 = vcmp.gt.f32.partialorder %v134_v14, 0.0  ;;  %v140_v16 = vmul.f32 0.01, %v134_v14 }
  0xfb   :  { %v142_v18 = vsel %vm138_vm3, %v134_v14, %v140_v16 }
  0xfc   :  { %v143_v19 = vpack.c.bf16 %v142_v18, %v141_v17 }
  0xfe   :  { %287 = vmatmul.mubr.msk.bf16.vlgmr.msra.gmra.mxu1 %vm92_vm1, %v143_v19 }
 0x1be   :  { %v204_v21 = vpop.f32.mrf.mxu1 }
 0x1bf   :  { %v205_v22 = vadd.f32 %v259_v20, %v204_v21 }
 0x1c0   :  { %v288_v23 = vpop.f32.mrf.mxu1 }
 0x1c1   :  { %vm211_vm4 = vcmp.gt.f32.partialorder %v205_v22, 0.0  ;;  %v213_v24 = vmul.f32 0.01, %v205_v22 }
 0x1c2   :  { %v207_v26 = vpop.f32.mrf.mxu1 }
 0x1c3   :  { %v215_v27 = vsel %vm211_vm4, %v205_v22, %v213_v24  ;;  %v208_v28 = vadd.f32 %v259_v20, %v207_v26 }
 0x1c4   :  { %v224_v29 = vmul.f32 %v263_v25, %v215_v27  ;;  %v289_v30 = vpop.f32.mrf.mxu1 }
 0x1c5   :  { %vm212_vm5 = vcmp.gt.f32.partialorder %v208_v28, 0.0  ;;  %v214_v31 = vmul.f32 0.01, %v208_v28 }
 0x1c6   :  { %v266_v32 = vpack.c.bf16 %v224_v29, %v224_v29 }
 0x1c7   :  { %v216_v33 = vsel %vm212_vm5, %v208_v28, %v214_v31 }
 0x1c8   :  { %v225_v34 = vmul.f32 %v263_v25, %v216_v33  ;;  %235 = vst.msk [vmem:[#allocation8] sm:$0xf] %vm234_vm6, %v266_v32 }
 0x1ca   :  { %v267_v35 = vpack.c.bf16 %v225_v34, %v225_v34 }
 0x1cc   :  { %236 = vst.msk [vmem:[#allocation8 + $0x4] sm:$0xf] %vm234_vm6, %v267_v35 }
 0x1cd   :  { %375 = shalt.err (!%p372_p5)
}
 0x1ce   :  { %248 = dma.vmem_to_hbm [thread:$0]  %s243_s18, 128, %s473_s6, [#allocation4], %s391_s24, %s391_s24, %s392_s25  }
 0x1cf   :  { %388 = dma.done.wait [#allocation4], 128  }
 0x1d0   :  { %389 = vsyncadd [#allocation4], 4294967168 }
 0x1d1   :  { %252 = vsyncpa [#allocation3], 1 }
 0x1d2   :  { %253 = vsyncpa [#allocation6], 1 }
 0x1d3   :  { %254 = vsyncpa [#allocation4], 1 }

</bundles_post_ra>
